<compile_context>
chip_gen: v7x
topology: tpu7x:2x2x1
jax: 0.10.0
libtpu: 0.0.40
codegen_flags: <defaults>
</compile_context>

<pallas_src>
import math

import jax
import jax.numpy as jnp
from jax import lax
from jax.experimental import pallas as pl
from jax.experimental.pallas import tpu as pltpu


def _round_up(x, m):
    return ((x + m - 1) // m) * m


def _zcell_chunk_kernel(wcat_ref, h0_ref, prex_ref, out_ref, h_scratch):
    """One grid step = Tc recurrent timesteps of the z-cell over one chunk."""

    # Load the initial hidden state into the resident VMEM accumulator once.
    @pl.when(pl.program_id(0) == 0)
    def _():
        h_scratch[...] = h0_ref[...]

    tc = out_ref.shape[0]
    hp = out_ref.shape[-1]
    w_cat = wcat_ref[...]                                   # (Hp, 2Hp), matmul dtype

    def step(t, h):
        # h: (Bp, Hp) f32.  Matmul operands may be bf16; accumulate in f32.
        # The input projection + bias were precomputed outside the recurrence.
        pre = (jnp.dot(h.astype(w_cat.dtype), w_cat,
                       preferred_element_type=jnp.float32)
               + prex_ref[t])                               # (Bp, 2Hp) f32
        z = jax.nn.sigmoid(pre[:, :hp])                     # lane-aligned slices
        cand = jnp.tanh(pre[:, hp:])
        h_new = cand + z * (h - cand)                       # == z*h + (1-z)*cand
        out_ref[t] = h_new.astype(out_ref.dtype)
        return h_new

    h_scratch[...] = lax.fori_loop(0, tc, step, h_scratch[...], unroll=True)


def zcell_forward_seq(params, h0, x_seq, *, tc=8, matmul_dtype=jnp.bfloat16):
    """Run T recurrent trainableZCell steps in a single pallas_call.

    params: dict with w_z (H,H), p_z (H,I), b_z (H,1), w (H,H), p (H,I), b (H,1)
    h0:     (B, H) initial hidden state (the module starts from zeros)
    x_seq:  (T, B, I) inputs, one (batch, features) row-major tile per step
    returns (T, B, H): the hidden state after each step (all f32)
    """
    H = params["w_z"].shape[0]
    T, B, I = x_seq.shape

    Hp = _round_up(H, 128)          # lane-aligned hidden size
    Bp = _round_up(B, 8)            # f32 sublane-aligned batch
    Tc = max(1, min(tc, T))         # timesteps per grid iteration
    Tp = _round_up(T, Tc)

    f32 = jnp.float32
    # Stacked, pre-transposed, zero-padded gate weights: z gate first, cand second.
    w_cat = jnp.zeros((Hp, 2 * Hp), f32)
    w_cat = w_cat.at[:H, :H].set(params["w_z"].T.astype(f32))
    w_cat = w_cat.at[:H, Hp:Hp + H].set(params["w"].T.astype(f32))
    p_cat = jnp.zeros((I, 2 * Hp), f32)
    p_cat = p_cat.at[:, :H].set(params["p_z"].T.astype(f32))
    p_cat = p_cat.at[:, Hp:Hp + H].set(params["p"].T.astype(f32))
    b_cat = jnp.zeros((1, 2 * Hp), f32)
    b_cat = b_cat.at[:, :H].set(params["b_z"].T.astype(f32))
    b_cat = b_cat.at[:, Hp:Hp + H].set(params["b"].T.astype(f32))

    # Hoisted input projection (no recurrent dependency): one big matmul over all
    # timesteps, bias folded in.  Runs as plain XLA outside the serial kernel.
    pre_x = jnp.einsum("tbi,ih->tbh", x_seq.astype(f32), p_cat) + b_cat  # (T,B,2Hp)
    pre_x = jnp.pad(pre_x, ((0, Tp - T), (0, Bp - B), (0, 0)))

    h0p = jnp.pad(h0.astype(f32), ((0, Bp - B), (0, Hp - H)))
    w_cat_k = w_cat.astype(matmul_dtype)

    # VMEM budget: resident W_cat + h0 + double-buffered pre_x/out streams + scratch.
    wsize = jnp.dtype(matmul_dtype).itemsize
    needed = (2 * Hp * 2 * Hp * wsize
              + 2 * Bp * Hp * 4
              + 2 * Tc * Bp * 2 * Hp * 4
              + 2 * Tc * Bp * Hp * 4
              + Bp * Hp * 4)
    vmem_limit = int(min(64 << 20, max(32 << 20, 2 * needed)))

    grid_spec = pltpu.PrefetchScalarGridSpec(
        num_scalar_prefetch=0,
        grid=(Tp // Tc,),
        in_specs=[
            pl.BlockSpec((Hp, 2 * Hp), lambda c: (0, 0)),        # W_cat (resident)
            pl.BlockSpec((Bp, Hp), lambda c: (0, 0)),            # h0    (resident)
            pl.BlockSpec((Tc, Bp, 2 * Hp), lambda c: (c, 0, 0)),  # pre_x stream
        ],
        out_specs=pl.BlockSpec((Tc, Bp, Hp), lambda c: (c, 0, 0)),
        scratch_shapes=[pltpu.VMEM((Bp, Hp), jnp.float32)],       # hidden-state carry
    )

    out = pl.pallas_call(
        _zcell_chunk_kernel,
        out_shape=jax.ShapeDtypeStruct((Tp, Bp, Hp), jnp.float32),
        grid_spec=grid_spec,
        compiler_params=pltpu.CompilerParams(
            dimension_semantics=("arbitrary",),    # time recurrence is serial
            vmem_limit_bytes=vmem_limit,
        ),
    )(w_cat_k, h0p, pre_x)

    return out[:T, :B, :H]


def zcell_forward(params, h_t, x, *, matmul_dtype=jnp.bfloat16):
    """Single step with the module's layouts: h_t (1,H)/(B,H), x (I,B) -> (B,H)."""
    H = params["w_z"].shape[0]
    if h_t.ndim == 3:
        h_t = h_t[0]
    assert h_t.ndim == 2 and h_t.shape[-1] == H, (
        f"h_t must be (1, H) or (B, H) row-major, got {h_t.shape}")
    I, B = x.shape
    h0 = jnp.broadcast_to(h_t.astype(jnp.float32), (B, H))
    x_seq = jnp.transpose(x)[None]                # (1, B, I)
    return zcell_forward_seq(params, h0, x_seq, tc=1, matmul_dtype=matmul_dtype)[0]


def init_params(key, input_size, hidden_size):
    bound = 1.0 / math.sqrt(hidden_size)
    ks = jax.random.split(key, 6)
    u = lambda k, shape: jax.random.uniform(
        k, shape, minval=-bound, maxval=bound, dtype=jnp.float32)
    return {
        "w_z": u(ks[0], (hidden_size, hidden_size)),
        "p_z": u(ks[1], (hidden_size, input_size)),
        "b_z": u(ks[2], (hidden_size, 1)),
        "w":   u(ks[3], (hidden_size, hidden_size)),
        "p":   u(ks[4], (hidden_size, input_size)),
        "b":   u(ks[5], (hidden_size, 1)),
    }


def _reference_seq(params, h_t, x_seq_cols):
    """Faithful JAX mirror of the PyTorch module, stepped T times.

    h_t starts as (1, H) (broadcast on the first step), x_seq_cols is (T, I, B).
    """
    hs = []
    for t in range(x_seq_cols.shape[0]):
        x = x_seq_cols[t]                                              # (I, B)
        h = jnp.transpose(h_t)                                         # (H, ?)
        z = jax.nn.sigmoid(params["w_z"] @ h + params["p_z"] @ x + params["b_z"])
        cand = jnp.tanh(params["w"] @ h + params["p"] @ x + params["b"])
        h_new = z * h + (1.0 - z) * cand                               # (H, B)
        h_t = jnp.transpose(h_new)                                     # (B, H)
        hs.append(h_t)
    return jnp.stack(hs)                                               # (T, B, H)


if __name__ == "__main__":
    input_size, hidden_size, batch, steps = 16, 32, 4, 10

    key = jax.random.PRNGKey(0)
    kp, kx = jax.random.split(key)
    params = init_params(kp, input_size, hidden_size)

    # Inputs in the module's column layout (T, input_size, batch) ...
    x_seq_cols = jax.random.normal(kx, (steps, input_size, batch), dtype=jnp.float32)
    # ... and in the kernel's row layout (T, batch, input_size).
    x_seq = jnp.transpose(x_seq_cols, (0, 2, 1))
    h0 = jnp.zeros((batch, hidden_size), dtype=jnp.float32)

    ref_seq = _reference_seq(
        params, jnp.zeros((1, hidden_size), jnp.float32), x_seq_cols)

    # f32 matmul path, Tc=4 (exercises cross-chunk hidden-state carry + tail
    # padding of T): must match the reference tightly.
    h_f32 = jax.block_until_ready(
        zcell_forward_seq(params, h0, x_seq, tc=4, matmul_dtype=jnp.float32))
    assert h_f32.shape == (steps, batch, hidden_size)
    assert jnp.allclose(h_f32, ref_seq, atol=1e-4, rtol=1e-4), "f32 mismatch"

    # bf16-weight fast path (default): MXU operands bf16, f32 accumulation and
    # f32 activations / hidden-state carry — looser tolerance vs f32 reference.
    h_bf16 = jax.block_until_ready(
        zcell_forward_seq(params, h0, x_seq, tc=8, matmul_dtype=jnp.bfloat16))
    assert h_bf16.shape == (steps, batch, hidden_size)
    assert jnp.allclose(h_bf16, ref_seq, atol=3e-2, rtol=3e-2), "bf16 mismatch"

    # Single-step wrapper matching the module's forward() call signature.
    h1 = jax.block_until_ready(
        zcell_forward(params, jnp.zeros((1, hidden_size), jnp.float32),
                      x_seq_cols[0], matmul_dtype=jnp.float32))
    assert h1.shape == (batch, hidden_size)
    assert jnp.allclose(h1, ref_seq[0], atol=1e-4, rtol=1e-4), "single-step mismatch"

    print("KERNEL_OK")
</pallas_src>

<mosaic_0001>
module attributes {stable_mosaic.version = 11 : i64} {
  func.func @_zcell_chunk_kernel(%arg0: i32, %arg1: memref<128x256xf32, #tpu.memory_space<vmem>>, %arg2: memref<8x128xf32, #tpu.memory_space<vmem>>, %arg3: memref<4x8x256xf32, #tpu.memory_space<vmem>>, %arg4: memref<4x8x128xf32, #tpu.memory_space<vmem>>, %arg5: memref<8x128xf32, #tpu.memory_space<vmem>>) attributes {dimension_semantics = [#tpu.dimension_semantics<arbitrary>], iteration_bounds = array<i64: 3>, scalar_prefetch = 0 : i64, scratch_operands = 1 : i64, tpu.core_type = #tpu.core_type<tc>, window_params = [{pipeline_mode = #tpu.pipeline_mode<synchronous>, transform_indices = @transform_0, window_bounds = array<i64: 128, 256>}, {pipeline_mode = #tpu.pipeline_mode<synchronous>, transform_indices = @transform_1, window_bounds = array<i64: 8, 128>}, {transform_indices = @transform_2, window_bounds = array<i64: 4, 8, 256>}, {transform_indices = @transform_3, window_bounds = array<i64: 4, 8, 128>}]} {
    %c0_i32 = arith.constant 0 : i32
    %0 = arith.cmpi eq, %arg0, %c0_i32 : i32
    %1 = arith.extui %0 : i1 to i32
    %c0_i32_0 = arith.constant 0 : i32
    %2 = arith.cmpi ne, %1, %c0_i32_0 : i32
    scf.if %2 {
      %c0_30 = arith.constant 0 : index
      %c0_31 = arith.constant 0 : index
      %86 = vector.load %arg2[%c0_30, %c0_31] : memref<8x128xf32, #tpu.memory_space<vmem>>, vector<8x128xf32>
      %c0_32 = arith.constant 0 : index
      %c0_33 = arith.constant 0 : index
      %87 = vector.load %arg5[%c0_32, %c0_33] : memref<8x128xf32, #tpu.memory_space<vmem>>, vector<8x128xf32>
      tpu.vector_store %arg5[%c0_32, %c0_33], %86 {strides = array<i32>} : memref<8x128xf32, #tpu.memory_space<vmem>>, vector<8x128xf32>,
    } else {
    }
    %c0 = arith.constant 0 : index
    %c0_1 = arith.constant 0 : index
    %3 = vector.load %arg1[%c0, %c0_1] : memref<128x256xf32, #tpu.memory_space<vmem>>, vector<128x256xf32>
    %c0_2 = arith.constant 0 : index
    %c0_3 = arith.constant 0 : index
    %4 = vector.load %arg5[%c0_2, %c0_3] : memref<8x128xf32, #tpu.memory_space<vmem>>, vector<8x128xf32>
    %c0_i32_4 = arith.constant 0 : i32
    %cst = arith.constant dense<0.000000e+00> : vector<8x256xf32>
    %5 = tpu.matmul %4, %3, %cst {dimension_numbers = #tpu.dot_dimension_numbers<[1], [0], [0], [1], [0, 0, 1, 1], [], []>} : vector<8x128xf32>, vector<128x256xf32>, vector<8x256xf32> -> vector<8x256xf32>
    %6 = arith.index_cast %c0_i32_4 : i32 to index
    %c0_5 = arith.constant 0 : index
    %c0_6 = arith.constant 0 : index
    %7 = vector.load %arg3[%6, %c0_5, %c0_6] : memref<4x8x256xf32, #tpu.memory_space<vmem>>, vector<1x8x256xf32>
    %8 = vector.shape_cast %7 : vector<1x8x256xf32> to vector<8x256xf32>
    %9 = arith.addf %5, %8 : vector<8x256xf32>
    %10 = vector.extract_strided_slice %9 {offsets = [0, 0], sizes = [8, 128], strides = [1, 1]} : vector<8x256xf32> to vector<8x128xf32>
    %11 = arith.negf %10 : vector<8x128xf32>
    %12 = math.exp %11 : vector<8x128xf32>
    %cst_7 = arith.constant 1.000000e+00 : f32
    %13 = vector.broadcast %cst_7 : f32 to vector<8x128xf32>
    %14 = arith.addf %13, %12 : vector<8x128xf32>
    %15 = arith.divf %13, %14 : vector<8x128xf32>
    %16 = vector.extract_strided_slice %9 {offsets = [0, 128], sizes = [8, 128], strides = [1, 1]} : vector<8x256xf32> to vector<8x128xf32>
    %17 = math.tanh %16 : vector<8x128xf32>
    %18 = arith.subf %4, %17 : vector<8x128xf32>
    %19 = arith.mulf %15, %18 : vector<8x128xf32>
    %20 = arith.addf %17, %19 : vector<8x128xf32>
    %21 = arith.index_cast %c0_i32_4 : i32 to index
    %c0_8 = arith.constant 0 : index
    %c0_9 = arith.constant 0 : index
    %22 = vector.load %arg4[%21, %c0_8, %c0_9] : memref<4x8x128xf32, #tpu.memory_space<vmem>>, vector<1x8x128xf32>
    %23 = vector.shape_cast %22 : vector<1x8x128xf32> to vector<8x128xf32>
    %24 = vector.shape_cast %20 : vector<8x128xf32> to vector<1x8x128xf32>
    tpu.vector_store %arg4[%21, %c0_8, %c0_9], %24 {strides = array<i32>} : memref<4x8x128xf32, #tpu.memory_space<vmem>>, vector<1x8x128xf32>,
    %c1_i32 = arith.constant 1 : i32
    %cst_10 = arith.constant dense<0.000000e+00> : vector<8x256xf32>
    %25 = tpu.matmul %20, %3, %cst_10 {dimension_numbers = #tpu.dot_dimension_numbers<[1], [0], [0], [1], [0, 0, 1, 1], [], []>} : vector<8x128xf32>, vector<128x256xf32>, vector<8x256xf32> -> vector<8x256xf32>
    %26 = arith.index_cast %c1_i32 : i32 to index
    %c0_11 = arith.constant 0 : index
    %c0_12 = arith.constant 0 : index
    %27 = vector.load %arg3[%26, %c0_11, %c0_12] : memref<4x8x256xf32, #tpu.memory_space<vmem>>, vector<1x8x256xf32>
    %28 = vector.shape_cast %27 : vector<1x8x256xf32> to vector<8x256xf32>
    %29 = arith.addf %25, %28 : vector<8x256xf32>
    %30 = vector.extract_strided_slice %29 {offsets = [0, 0], sizes = [8, 128], strides = [1, 1]} : vector<8x256xf32> to vector<8x128xf32>
    %31 = arith.negf %30 : vector<8x128xf32>
    %32 = math.exp %31 : vector<8x128xf32>
    %cst_13 = arith.constant 1.000000e+00 : f32
    %33 = vector.broadcast %cst_13 : f32 to vector<8x128xf32>
    %34 = arith.addf %33, %32 : vector<8x128xf32>
    %35 = arith.divf %33, %34 : vector<8x128xf32>
    %36 = vector.extract_strided_slice %29 {offsets = [0, 128], sizes = [8, 128], strides = [1, 1]} : vector<8x256xf32> to vector<8x128xf32>
    %37 = math.tanh %36 : vector<8x128xf32>
    %38 = arith.subf %20, %37 : vector<8x128xf32>
    %39 = arith.mulf %35, %38 : vector<8x128xf32>
    %40 = arith.addf %37, %39 : vector<8x128xf32>
    %41 = arith.index_cast %c1_i32 : i32 to index
    %c0_14 = arith.constant 0 : index
    %c0_15 = arith.constant 0 : index
    %42 = vector.load %arg4[%41, %c0_14, %c0_15] : memref<4x8x128xf32, #tpu.memory_space<vmem>>, vector<1x8x128xf32>
    %43 = vector.shape_cast %42 : vector<1x8x128xf32> to vector<8x128xf32>
    %44 = vector.shape_cast %40 : vector<8x128xf32> to vector<1x8x128xf32>
    tpu.vector_store %arg4[%41, %c0_14, %c0_15], %44 {strides = array<i32>} : memref<4x8x128xf32, #tpu.memory_space<vmem>>, vector<1x8x128xf32>,
    %c2_i32 = arith.constant 2 : i32
    %cst_16 = arith.constant dense<0.000000e+00> : vector<8x256xf32>
    %45 = tpu.matmul %40, %3, %cst_16 {dimension_numbers = #tpu.dot_dimension_numbers<[1], [0], [0], [1], [0, 0, 1, 1], [], []>} : vector<8x128xf32>, vector<128x256xf32>, vector<8x256xf32> -> vector<8x256xf32>
    %46 = arith.index_cast %c2_i32 : i32 to index
    %c0_17 = arith.constant 0 : index
    %c0_18 = arith.constant 0 : index
    %47 = vector.load %arg3[%46, %c0_17, %c0_18] : memref<4x8x256xf32, #tpu.memory_space<vmem>>, vector<1x8x256xf32>
    %48 = vector.shape_cast %47 : vector<1x8x256xf32> to vector<8x256xf32>
    %49 = arith.addf %45, %48 : vector<8x256xf32>
    %50 = vector.extract_strided_slice %49 {offsets = [0, 0], sizes = [8, 128], strides = [1, 1]} : vector<8x256xf32> to vector<8x128xf32>
    %51 = arith.negf %50 : vector<8x128xf32>
    %52 = math.exp %51 : vector<8x128xf32>
    %cst_19 = arith.constant 1.000000e+00 : f32
    %53 = vector.broadcast %cst_19 : f32 to vector<8x128xf32>
    %54 = arith.addf %53, %52 : vector<8x128xf32>
    %55 = arith.divf %53, %54 : vector<8x128xf32>
    %56 = vector.extract_strided_slice %49 {offsets = [0, 128], sizes = [8, 128], strides = [1, 1]} : vector<8x256xf32> to vector<8x128xf32>
    %57 = math.tanh %56 : vector<8x128xf32>
    %58 = arith.subf %40, %57 : vector<8x128xf32>
    %59 = arith.mulf %55, %58 : vector<8x128xf32>
    %60 = arith.addf %57, %59 : vector<8x128xf32>
    %61 = arith.index_cast %c2_i32 : i32 to index
    %c0_20 = arith.constant 0 : index
    %c0_21 = arith.constant 0 : index
    %62 = vector.load %arg4[%61, %c0_20, %c0_21] : memref<4x8x128xf32, #tpu.memory_space<vmem>>, vector<1x8x128xf32>
    %63 = vector.shape_cast %62 : vector<1x8x128xf32> to vector<8x128xf32>
    %64 = vector.shape_cast %60 : vector<8x128xf32> to vector<1x8x128xf32>
    tpu.vector_store %arg4[%61, %c0_20, %c0_21], %64 {strides = array<i32>} : memref<4x8x128xf32, #tpu.memory_space<vmem>>, vector<1x8x128xf32>,
    %c3_i32 = arith.constant 3 : i32
    %cst_22 = arith.constant dense<0.000000e+00> : vector<8x256xf32>
    %65 = tpu.matmul %60, %3, %cst_22 {dimension_numbers = #tpu.dot_dimension_numbers<[1], [0], [0], [1], [0, 0, 1, 1], [], []>} : vector<8x128xf32>, vector<128x256xf32>, vector<8x256xf32> -> vector<8x256xf32>
    %66 = arith.index_cast %c3_i32 : i32 to index
    %c0_23 = arith.constant 0 : index
    %c0_24 = arith.constant 0 : index
    %67 = vector.load %arg3[%66, %c0_23, %c0_24] : memref<4x8x256xf32, #tpu.memory_space<vmem>>, vector<1x8x256xf32>
    %68 = vector.shape_cast %67 : vector<1x8x256xf32> to vector<8x256xf32>
    %69 = arith.addf %65, %68 : vector<8x256xf32>
    %70 = vector.extract_strided_slice %69 {offsets = [0, 0], sizes = [8, 128], strides = [1, 1]} : vector<8x256xf32> to vector<8x128xf32>
    %71 = arith.negf %70 : vector<8x128xf32>
    %72 = math.exp %71 : vector<8x128xf32>
    %cst_25 = arith.constant 1.000000e+00 : f32
    %73 = vector.broadcast %cst_25 : f32 to vector<8x128xf32>
    %74 = arith.addf %73, %72 : vector<8x128xf32>
    %75 = arith.divf %73, %74 : vector<8x128xf32>
    %76 = vector.extract_strided_slice %69 {offsets = [0, 128], sizes = [8, 128], strides = [1, 1]} : vector<8x256xf32> to vector<8x128xf32>
    %77 = math.tanh %76 : vector<8x128xf32>
    %78 = arith.subf %60, %77 : vector<8x128xf32>
    %79 = arith.mulf %75, %78 : vector<8x128xf32>
    %80 = arith.addf %77, %79 : vector<8x128xf32>
    %81 = arith.index_cast %c3_i32 : i32 to index
    %c0_26 = arith.constant 0 : index
    %c0_27 = arith.constant 0 : index
    %82 = vector.load %arg4[%81, %c0_26, %c0_27] : memref<4x8x128xf32, #tpu.memory_space<vmem>>, vector<1x8x128xf32>
    %83 = vector.shape_cast %82 : vector<1x8x128xf32> to vector<8x128xf32>
    %84 = vector.shape_cast %80 : vector<8x128xf32> to vector<1x8x128xf32>
    tpu.vector_store %arg4[%81, %c0_26, %c0_27], %84 {strides = array<i32>} : memref<4x8x128xf32, #tpu.memory_space<vmem>>, vector<1x8x128xf32>,
    %c4_i32 = arith.constant 4 : i32
    %c0_28 = arith.constant 0 : index
    %c0_29 = arith.constant 0 : index
    %85 = vector.load %arg5[%c0_28, %c0_29] : memref<8x128xf32, #tpu.memory_space<vmem>>, vector<8x128xf32>
    tpu.vector_store %arg5[%c0_28, %c0_29], %80 {strides = array<i32>} : memref<8x128xf32, #tpu.memory_space<vmem>>, vector<8x128xf32>,
    return
  }
  func.func @transform_0(%arg0: i32) -> (i32, i32) {
    %c0_i32 = arith.constant 0 : i32
    %c0_i32_0 = arith.constant 0 : i32
    %c0_i32_1 = arith.constant 0 : i32
    return %c0_i32, %c0_i32_0 : i32, i32
  }
  func.func @transform_1(%arg0: i32) -> (i32, i32) {
    %c0_i32 = arith.constant 0 : i32
    %c0_i32_0 = arith.constant 0 : i32
    %c0_i32_1 = arith.constant 0 : i32
    return %c0_i32, %c0_i32_0 : i32, i32
  }
  func.func @transform_2(%arg0: i32) -> (i32, i32, i32) {
    %c0_i32 = arith.constant 0 : i32
    %c0_i32_0 = arith.constant 0 : i32
    %c0_i32_1 = arith.constant 0 : i32
    return %arg0, %c0_i32, %c0_i32_0 : i32, i32, i32
  }
  func.func @transform_3(%arg0: i32) -> (i32, i32, i32) {
    %c0_i32 = arith.constant 0 : i32
    %c0_i32_0 = arith.constant 0 : i32
    %c0_i32_1 = arith.constant 0 : i32
    return %arg0, %c0_i32, %c0_i32_0 : i32, i32, i32
  }
}

</mosaic_0001>

<bundles_post_ra>
// kernel: tpu_custom_call.1
= control target key start
LH: loop header
LB: loop body
LE: loop exit
PB: predicated region body
PF: predicated region fallthrough
CT: control target
= control target key end

     0   :  { %8 = vsyncpa [#allocation4], 0  ;;  %s1506_s0 = inlined_call_operand.hbm [shape: f32[128,256], index: 0, kind: input, shape index: {}]   ;;  %s1507_s1 = inlined_call_operand.hbm [shape: f32[8,128], index: 1, kind: input, shape index: {}]   ;;  %s1508_s2 = inlined_call_operand.hbm [shape: f32[12,8,256], index: 2, kind: input, shape index: {}]   ;;  %s1509_s3 = inlined_call_operand.hbm [shape: f32[12,8,128], index: 3, kind: output, shape index: {}]  }
   0x1   :  { %9 = vsyncpa [#allocation7], 0 }
   0x2   :  { %10 = vsyncpa [#allocation5], 0 }
   0x3   :  { %12 = vsyncpa [#allocation5 + $0x1], 0  ;;  %s1156_s12 = smov 0   ;;  %s1158_s13 = smov 0  }
   0x4   :  { %s1160_s14 = smov 0   ;;  %s1162_s15 = smov 0  }
   0x5 LB: > { %s1177_s16 = sadd.s32 4294967295, %s1125_s15   ;;  %s705_s17 = sadd.s32 4294967294, %s1125_s15   ;;  %s1125_s15 = sphi %s1162_s15, %s1537_s15   ;;  %s1121_s14 = sphi %s1160_s14, %s1536_s14   ;;  %s1117_s13 = sphi %s1158_s13, %s1535_s13   ;;  %s1113_s12 = sphi %s1156_s12, %s1534_s12  }
   0x6   : > { %s1181_s18 = sadd.s32 1, %s1125_s15   ;;  %s67_s19 = sadd.s32 1, %s1121_s14 }
   0x7   : > { %s64_s20 = ssub.s32 %s1125_s15, %s1181_s18  ;;  %p74_p0 = scmp.ne.s32.totalorder %s1121_s14, %s1117_s13 }
   0x8   : > { %p65_p1 = scmp.eq.s32.totalorder %s64_s20, 0  ;;  %p75_p2 = scmp.eq.s32.totalorder %s1125_s15, 0 }
   0x9   : > { %p80_p3 = scmp.ne.s32.totalorder %s1117_s13, %s1113_s12  ;;  %p1510_p4 = scmp.eq.s32.totalorder %s1177_s16, 0 }
   0xa   : > { %s1193_s21 = scalar_select %p65_p1, %s1121_s14, %s67_s19  }
   0xb   : > { %p1195_p5 = por %p75_p2, %p74_p0  ;;  %p1201_p6 = por %p1510_p4, %p80_p3 }
   0xc   : > { %p104_p7 = scmp.eq.s32.totalorder %s1177_s16, 2  ;;  %p110_p8 = scmp.eq.s32.totalorder %s705_s17, 2 }
   0xd   : > { %s1515_s22 = scalar_select %p1195_p5, 1, 0 }
   0xe   : > { %s1516_s23 = scalar_select %p1201_p6, 1, 0 }
   0xf   : > { %p706_p9 = scmp.ge.s32.totalorder %s1125_s15, 1  ;;  %p117_p10 = scmp.lt.s32.totalorder %s1125_s15, 4 }
  0x10   : > { %p1208_p11 = por %p104_p7, %p74_p0  ;;  %p1212_p12 = por %p110_p8, %p80_p3 }
  0x11   : > { %p1216_p13 = pnand %p706_p9, %p117_p10  ;;  %s1127_s27 = smov [#allocation3]  }
  0x12   : > { %s1517_s24 = scalar_select %p1208_p11, 1, 0 }
  0x13   : > { %s1518_s25 = scalar_select %p1212_p12, 1, 0 }
  0x14   : > { %s1519_s26 = scalar_select %p1216_p13, 1, 0 }
  0x15   : > { %p881_p2 = pneg %p1216_p13  ;;  %s129_s28 = sshll.u32 %s1127_s27, 4  ;;  %s130_s28 = int_to_ptr.vmem [resolvable:$true] %s129_s28 }
  0x16   : > { %s1128_s30 = smov [#allocation6]   ;;  %s965_s7 = scalar_lea.hbm %s1506_s0, 4096 }
  0x17   : > { %p1225_p0 = pnand %p881_p2, %p1510_p4  ;;  %s143_s4 = sshll.u32 %s1128_s30, 4  ;;  %s144_s4 = int_to_ptr.vmem [resolvable:$true] %s143_s4 }
  0x18   : > { %p966_p7 = scmp.ne.s32.totalorder %s1506_s0, %s965_s7  ;;  %p972_p2 = scmp.lt.u32.totalorder %s965_s7, %s1506_s0 }
  0x19   : > { %p967_p8 = pneg %p1225_p0 }
  0x1b   : > { %p968_p9 = pnand %p967_p8, %p966_p7 }
  0x1d   : > { %p969_p10 = pneg %p968_p9 }
  0x1f   : > { %p974_p1 = pnand %p972_p2, %p969_p10 }
  0x21   : > { %977 = shalt.err (!%p974_p1)
}
  0x22   : > { %s978_s17 = scalar_lea.vmem %s130_s28, 4096  ;;  %p986_p11 = scmp.lt.s32.totalorder %s130_s28, %s130_s28 }
  0x23   : > { %p979_p4 = scmp.ne.s32.totalorder %s130_s28, %s978_s17  ;;  %p987_p6 = scmp.lt.s32.totalorder %s978_s17, %s978_s17 }
  0x25   : > { %p981_p3 = pnand %p979_p4, %p967_p8  ;;  %p988_p13 = por %p987_p6, %p986_p11 }
  0x27   : > { %p982_p12 = pneg %p981_p3 }
  0x29   : > { %p989_p5 = pnand %p988_p13, %p982_p12 }
  0x2b   : > { %992 = shalt.err (!%p989_p5)
}
  0x2c   : > { %s1129_s19 = smov 256   ;;  %s1130_s20 = smov 16  }
  0x2d   : > { %884 = dma.hbm_to_vmem [thread:$0]  (!%p1225_p0), %s1506_s0, 4096, %s130_s28, [#allocation4], %s1129_s19, %s1129_s19, %s1130_s20  }
  0x2e   : > { %p1521_p4 = scmp.ne.s32.totalorder %s1515_s22, 0  ;;  %p1522_p1 = scmp.lt.s32.totalorder %s1125_s15, 3 }
  0x2f   : > { %s993_s8 = scalar_lea.hbm %s1507_s1, 128 }
  0x30   : > { %p1259_p3 = pnand %p1522_p1, %p1521_p4  ;;  %p994_p5 = scmp.ne.s32.totalorder %s1507_s1, %s993_s8 }
  0x31   : > { %p1000_p12 = scmp.lt.u32.totalorder %s993_s8, %s1507_s1 }
  0x32   : > { %s1523_s5 = scalar_select %p1259_p3, 1, 0 }
  0x33   : > { %p996_p6 = pnand %p994_p5, %p967_p8 }
  0x35   : > { %p997_p11 = pneg %p996_p6 }
  0x37   : > { %p1002_p13 = pnand %p1000_p12, %p997_p11 }
  0x39   : > { %1005 = shalt.err (!%p1002_p13)
}
  0x3a   : > { %s1006_s11 = scalar_lea.vmem %s144_s4, 128  ;;  %p1014_p2 = scmp.lt.s32.totalorder %s144_s4, %s144_s4 }
  0x3b   : > { %p1007_p7 = scmp.ne.s32.totalorder %s144_s4, %s1006_s11  ;;  %p1015_p4 = scmp.lt.s32.totalorder %s1006_s11, %s1006_s11 }
  0x3d   : > { %p1009_p9 = pnand %p1007_p7, %p967_p8  ;;  %p1016_p1 = por %p1015_p4, %p1014_p2 }
  0x3f   : > { %p1010_p10 = pneg %p1009_p9 }
  0x41   : > { %p1017_p3 = pnand %p1016_p1, %p1010_p10 }
  0x43   : > { %1020 = shalt.err (!%p1017_p3)
}
  0x44   : > { %887 = dma.hbm_to_vmem [thread:$0]  (!%p1225_p0), %s1507_s1, 128, %s144_s4, [#allocation7]  }
  0x45   : > { %s154_s30 = sand.u32 1, %s1125_s15   ;;  %s156_s6 = sand.u32 1, %s1121_s14  }
  0x46   : > { %s710_s7 = sshll.u32 %s156_s6, 6  ;;  %s739_s8 = sshll.u32 %s1125_s15, 10 }
  0x47   : > { %s1289_s28 = scalar_lea.hbm %s1508_s2, %s739_s8  ;;  %s158_s29 = scalar_lea.vmem [#allocation8], %s710_s7 }
  0x48   : > { %s166_s22 = sshll.u32 %s158_s29, 4  ;;  %s1293_s11 = scalar_lea.sflag [#allocation4], %s154_s30  ;;  %s1291_s22 = int_to_ptr.vmem [resolvable:$true] %s166_s22 }
  0x49   : > { %s1021_s4 = scalar_lea.hbm %s1289_s28, 1024  ;;  %p1524_p8 = scmp.ne.s32.totalorder %s1523_s5, 0 }
  0x4a   : > { %p1022_p0 = scmp.ne.s32.totalorder %s1289_s28, %s1021_s4  ;;  %s1026_s6 = scalar_lea.hbm %s1508_s2, 3072 }
  0x4b   : > { %p1023_p3 = pneg %p1524_p8  ;;  %p1027_p11 = scmp.lt.u32.totalorder %s1289_s28, %s1508_s2 }
  0x4c   : > { %p1028_p12 = scmp.lt.u32.totalorder %s1026_s6, %s1021_s4  ;;  %p1030_p7 = scmp.lt.u32.totalorder %s1021_s4, %s1289_s28 }
  0x4d   : > { %p1024_p5 = pnand %p1023_p3, %p1022_p0 }
  0x4e   : > { %p1029_p13 = por %p1028_p12, %p1027_p11 }
  0x4f   : > { %p1025_p6 = pneg %p1024_p5 }
  0x50   : > { %p1031_p9 = por %p1030_p7, %p1029_p13 }
  0x52   : > { %p1032_p10 = pnand %p1031_p9, %p1025_p6 }
  0x54   : > { %1035 = shalt.err (!%p1032_p10)
}
  0x55   : > { %s1036_s30 = scalar_lea.vmem %s1291_s22, 1024  ;;  %s1131_s7 = smov [#allocation8]  }
  0x56   : > { %p1037_p2 = scmp.ne.s32.totalorder %s1291_s22, %s1036_s30  ;;  %s1041_s10 = sshll.u32 %s1131_s7, 4  ;;  %s1042_s10 = int_to_ptr.vmem [resolvable:$false] %s1041_s10 }
  0x57   : > { %s1043_s29 = scalar_lea.vmem %s1042_s10, 2048  ;;  %p1044_p0 = scmp.lt.s32.totalorder %s1291_s22, %s1042_s10 }
  0x58   : > { %p1039_p4 = pnand %p1037_p2, %p1023_p3  ;;  %p1045_p5 = scmp.lt.s32.totalorder %s1043_s29, %s1036_s30 }
  0x5a   : > { %p1040_p1 = pneg %p1039_p4  ;;  %p1046_p11 = por %p1045_p5, %p1044_p0 }
  0x5c   : > { %p1047_p12 = pnand %p1046_p11, %p1040_p1 }
  0x5e   : > { %1050 = shalt.err (!%p1047_p12)
}
  0x5f   : > { %891 = dma.hbm_to_vmem [thread:$0]  (!%p1524_p8), %s1289_s28, 1024, %s1291_s22, %s1293_s11, %s1129_s19, %s1129_s19, %s1130_s20  }
  0x60   : > { %p1525_p3 = scmp.ne.s32.totalorder %s1519_s26, 0 }
  0x61   : > { %p1526_p6 = scmp.eq.s32.totalorder (!%p1525_p3), %s1177_s16, 0 }
  0x62   : > { %178 = sbr.rel (%p1525_p3) target bundleno = 1149 (0x47d), region = 32 }
  0x69   : > { %1096 = dma.done.wait (%p1526_p6), [#allocation4], 4096   ;;  %p1527_p13 = pmov %p1526_p6 }
  0x6a   : > { %p1528_p7 = pmov %p1526_p6 }
  0x6b   : > { %1098 = vsyncadd (%p1527_p13), [#allocation4], 4294963200 }
  0x6c   : > { %1100 = dma.done.wait (%p1528_p7), [#allocation7], 128   ;;  %p1529_p9 = pmov %p1526_p6 }
  0x6d   : > { %s188_s5 = sand.u32 1, %s1177_s16   ;;  %s1336_s19 = sand.u32 1, %s1117_s13  }
  0x6e   : > { %1102 = vsyncadd (%p1529_p9), [#allocation7], 4294967168  ;;  %s717_s26 = sshll.u32 %s1336_s19, 6  ;;  %s189_s20 = scalar_lea.sflag [#allocation4], %s188_s5 }
  0x6f   : > { %s1339_s28 = scalar_lea.vmem [#allocation8], %s717_s26  ;;  %p1530_p8 = scmp.ne.s32.totalorder %s1516_s23, 0 }
  0x71   : > { %1104 = dma.done.wait (%p1530_p8), %s189_s20, 1024  }
  0x72   : > { %1106 = vsyncadd (%p1530_p8), %s189_s20, 4294966272  ;;  %s718_s22 = sshll.u32 %s1336_s19, 5  ;;  %p1531_p10 = scmp.ne.s32.totalorder %s1177_s16, 0 }
  0x73   : > { %s1346_s11 = scalar_lea.vmem [#allocation9], %s718_s22  ;;  %v221_v0 = vld [vmem:[#allocation6] sm:$0xff] (!%p1531_p10) }
  0x74   : > { %220 = sbr.rel (%p1531_p10) target bundleno = 123 (0x7b), region = 48  ;;  %222 = vst [vmem:[#allocation2] sm:$0xff] (!%p1531_p10), %v221_v0 }
  0x7b PF: > { %v224_v1 = vld [vmem:[#allocation3 + $0x8] sm:$0xff]  ;;  %v226_v2 = vld [vmem:[#allocation3 + $0x18] sm:$0xff]  ;;  %v223_v3 = vld [vmem:[#allocation3] sm:$0xff]  ;;  %v1132_v8 = vmov 0.0   ;;  %s740_s23 = sshll.u32 %s1177_s16, 9  ;;  %s613_s4 = sshll.u32 %s1346_s11, 4  ;;  %s1462_s4 = int_to_ptr.vmem [resolvable:$true] %s613_s4 }
  0x7c   : > { %v1350_v4 = vpack.c.bf16 %v226_v2, %v224_v1  ;;  %v225_v5 = vld [vmem:[#allocation3 + $0x10] sm:$0xff]  ;;  %v228_v6 = vld [vmem:[#allocation3 + $0x28] sm:$0xff]  ;;  %v230_v7 = vld [vmem:[#allocation3 + $0x38] sm:$0xff]  ;;  %322 = vmatprep.mubr.f32.mxu0 %v1132_v8  ;;  %407 = vmatprep.mubr.f32.mxu1 %v1132_v8  ;;  %s1460_s6 = scalar_lea.hbm %s1509_s3, %s740_s23  ;;  %s600_s8 = scalar_lea.sflag [#allocation5], %s1336_s19 }
  0x7d   : > { %v1354_v9 = vpack.c.bf16 %v225_v5, %v223_v3  ;;  %v1356_v10 = vpack.c.bf16 %v230_v7, %v228_v6  ;;  %v227_v11 = vld [vmem:[#allocation3 + $0x20] sm:$0xff]  ;;  %v229_v12 = vld [vmem:[#allocation3 + $0x30] sm:$0xff]  ;;  %v232_v13 = vld [vmem:[#allocation3 + $0x48] sm:$0xff]  ;;  %s1051_s9 = scalar_lea.vmem %s1462_s4, 512  ;;  %p1532_p4 = scmp.ne.s32.totalorder %s1517_s24, 0 }
  0x7e   : > { %742 = vmatprep.subr.bf16.mxu0 %v1350_v4  ;;  %v234_v14 = vld [vmem:[#allocation3 + $0x58] sm:$0xff]  ;;  %774 = vmatprep.subr.bf16.mxu1 %v1350_v4  ;;  %v1361_v15 = vpack.c.bf16 %v229_v12, %v227_v11  ;;  %v231_v17 = vld [vmem:[#allocation3 + $0x40] sm:$0xff]  ;;  %v233_v18 = vld [vmem:[#allocation3 + $0x50] sm:$0xff]  ;;  %p1052_p2 = scmp.ne.s32.totalorder %s1462_s4, %s1051_s9  ;;  %s1133_s16 = smov [#allocation9]  }
  0x7f   : > { %744 = vmatpush1.bf16.msra.mxu0 %v1354_v9  ;;  %776 = vmatpush1.bf16.msra.mxu1 %v1354_v9  ;;  %v1365_v16 = vpack.c.bf16 %v234_v14, %v232_v13  ;;  %v236_v19 = vld [vmem:[#allocation3 + $0x68] sm:$0xff]  ;;  %v238_v20 = vld [vmem:[#allocation3 + $0x78] sm:$0xff]  ;;  %v1369_v21 = vpack.c.bf16 %v233_v18, %v231_v17  ;;  %v235_v23 = vld [vmem:[#allocation3 + $0x60] sm:$0xff]  ;;  %s1055_s30 = sshll.u32 %s1133_s16, 4  ;;  %s1056_s30 = int_to_ptr.vmem [resolvable:$false] %s1055_s30 }
  0x80   : > { %746 = vmatprep.subr.bf16.mxu0 %v1356_v10  ;;  %778 = vmatprep.subr.bf16.mxu1 %v1356_v10  ;;  %v1373_v22 = vpack.c.bf16 %v238_v20, %v236_v19  ;;  %v237_v24 = vld [vmem:[#allocation3 + $0x70] sm:$0xff]  ;;  %v240_v25 = vld [vmem:[#allocation3 + $0x88] sm:$0xff]  ;;  %v242_v26 = vld [vmem:[#allocation3 + $0x98] sm:$0xff]  ;;  %p1053_p1 = pnand %p1052_p2, %p1532_p4  ;;  %s1057_s7 = scalar_lea.vmem %s1056_s30, 1024 }
  0x81   : > { %v1377_v27 = vpack.c.bf16 %v237_v24, %v235_v23  ;;  %v1381_v28 = vpack.c.bf16 %v242_v26, %v240_v25  ;;  %v239_v29 = vld [vmem:[#allocation3 + $0x80] sm:$0xff]  ;;  %v241_v30 = vld [vmem:[#allocation3 + $0x90] sm:$0xff]  ;;  %v244_v31 = vld [vmem:[#allocation3 + $0xa8] sm:$0xff]  ;;  %p1058_p5 = scmp.lt.s32.totalorder %s1462_s4, %s1056_s30  ;;  %p1059_p11 = scmp.lt.s32.totalorder %s1057_s7, %s1051_s9 }
  0x82   : > { %v246_v32 = vld [vmem:[#allocation3 + $0xb8] sm:$0xff]  ;;  %v1385_v33 = vpack.c.bf16 %v241_v30, %v239_v29  ;;  %v243_v35 = vld [vmem:[#allocation3 + $0xa0] sm:$0xff]  ;;  %v245_v36 = vld [vmem:[#allocation3 + $0xb0] sm:$0xff]  ;;  %p1054_p0 = pneg %p1053_p1 }
  0x83   : > { %748 = vmatpush1.bf16.msra.mxu0 %v1361_v15  ;;  %780 = vmatpush1.bf16.msra.mxu1 %v1361_v15  ;;  %v1389_v34 = vpack.c.bf16 %v246_v32, %v244_v31  ;;  %v248_v37 = vld [vmem:[#allocation3 + $0xc8] sm:$0xff]  ;;  %v250_v38 = vld [vmem:[#allocation3 + $0xd8] sm:$0xff]  ;;  %v1393_v39 = vpack.c.bf16 %v245_v36, %v243_v35  ;;  %v247_v41 = vld [vmem:[#allocation3 + $0xc0] sm:$0xff]  ;;  %p1060_p12 = por %p1059_p11, %p1058_p5 }
  0x84   : > { %750 = vmatprep.subr.bf16.mxu0 %v1365_v16  ;;  %782 = vmatprep.subr.bf16.mxu1 %v1365_v16  ;;  %v1397_v40 = vpack.c.bf16 %v250_v38, %v248_v37  ;;  %v249_v42 = vld [vmem:[#allocation3 + $0xd0] sm:$0xff]  ;;  %v252_v43 = vld [vmem:[#allocation3 + $0xe8] sm:$0xff]  ;;  %v254_v44 = vld [vmem:[#allocation3 + $0xf8] sm:$0xff] }
  0x85   : > { %v1401_v45 = vpack.c.bf16 %v249_v42, %v247_v41  ;;  %v1405_v46 = vpack.c.bf16 %v254_v44, %v252_v43  ;;  %v251_v47 = vld [vmem:[#allocation3 + $0xe0] sm:$0xff]  ;;  %v253_v48 = vld [vmem:[#allocation3 + $0xf0] sm:$0xff]  ;;  %v255_v50 = vld [vmem:[#allocation2] sm:$0xff]  ;;  %p1061_p3 = pnand %p1060_p12, %p1054_p0 }
  0x86   : > { %v771_v49 = vpack.c.bf16 %v253_v48, %v251_v47  ;;  %v256_v51 = vld [vmem:[%s1339_s28] sm:$0xff]  ;;  %v257_v56 = vld [vmem:[%s1339_s28 + $0x8] sm:$0xff]  ;;  %v721_v1 = vld [vmem:[%s1339_s28 + $0x10] sm:$0xff] }
  0x87   : > { %752 = vmatpush1.bf16.msra.mxu0 %v1369_v21  ;;  %784 = vmatpush1.bf16.msra.mxu1 %v1369_v21  ;;  %v722_v6 = vld [vmem:[%s1339_s28 + $0x18] sm:$0xff]  ;;  %v726_v20 = vld [vmem:[%s1339_s28 + $0x28] sm:$0xff]  ;;  %v729_v29 = vld [vmem:[%s1339_s28 + $0x30] sm:$0xff] }
  0x88   : > { %754 = vmatprep.subr.bf16.mxu0 %v1373_v22  ;;  %786 = vmatprep.subr.bf16.mxu1 %v1373_v22 }
  0x8b   : > { %756 = vmatpush1.bf16.msra.mxu0 %v1377_v27  ;;  %788 = vmatpush1.bf16.msra.mxu1 %v1377_v27 }
  0x8c   : > { %758 = vmatprep.subr.bf16.mxu0 %v1381_v28  ;;  %790 = vmatprep.subr.bf16.mxu1 %v1381_v28 }
  0x8f   : > { %760 = vmatpush1.bf16.msra.mxu0 %v1385_v33  ;;  %792 = vmatpush1.bf16.msra.mxu1 %v1385_v33 }
  0x90   : > { %762 = vmatprep.subr.bf16.mxu0 %v1389_v34  ;;  %794 = vmatprep.subr.bf16.mxu1 %v1389_v34 }
  0x93   : > { %764 = vmatpush1.bf16.msra.mxu0 %v1393_v39  ;;  %796 = vmatpush1.bf16.msra.mxu1 %v1393_v39 }
  0x94   : > { %766 = vmatprep.subr.bf16.mxu0 %v1397_v40  ;;  %798 = vmatprep.subr.bf16.mxu1 %v1397_v40 }
  0x97   : > { %768 = vmatpush1.bf16.msra.mxu0 %v1401_v45  ;;  %800 = vmatpush1.bf16.msra.mxu1 %v1401_v45 }
  0x98   : > { %770 = vmatprep.subr.bf16.mxu0 %v1405_v46  ;;  %802 = vmatprep.subr.bf16.mxu1 %v1405_v46 }
  0x9b   : > { %772 = vmatpush1.bf16.msra.mxu0 %v771_v49  ;;  %804 = vmatpush1.bf16.msra.mxu1 %v771_v49 }
  0x9c   : > { %806 = vmatprep.subr.bf16.mxu0 %v1350_v4  ;;  %838 = vmatprep.subr.bf16.mxu1 %v1350_v4 }
  0x9e   : > { %323 = vmatmul.mubr.f32.vlgmr.msra.gmra.mrb[0].mxu0 %v255_v50 }
  0x9f   : > { %808 = vmatpush1.bf16.msra.mxu0 %v1354_v9  ;;  %493 = vmatprep.mubr.f32.mxu0 %v1132_v8 }
  0xa0   : > { %810 = vmatprep.subr.bf16.mxu0 %v1356_v10 }
  0xa3   : > { %812 = vmatpush1.bf16.msra.mxu0 %v1361_v15 }
  0xa4   : > { %814 = vmatprep.subr.bf16.mxu0 %v1365_v16 }
  0xa7   : > { %816 = vmatpush1.bf16.msra.mxu0 %v1369_v21 }
  0xa8   : > { %818 = vmatprep.subr.bf16.mxu0 %v1373_v22 }
  0xab   : > { %820 = vmatpush1.bf16.msra.mxu0 %v1377_v27 }
  0xac   : > { %822 = vmatprep.subr.bf16.mxu0 %v1381_v28 }
  0xaf   : > { %824 = vmatpush1.bf16.msra.mxu0 %v1385_v33 }
  0xb0   : > { %826 = vmatprep.subr.bf16.mxu0 %v1389_v34 }
  0xb3   : > { %828 = vmatpush1.bf16.msra.mxu0 %v1393_v39 }
  0xb4   : > { %830 = vmatprep.subr.bf16.mxu0 %v1397_v40 }
  0xb7   : > { %832 = vmatpush1.bf16.msra.mxu0 %v1401_v45 }
  0xb8   : > { %834 = vmatprep.subr.bf16.mxu0 %v1405_v46 }
  0xbb   : > { %836 = vmatpush1.bf16.msra.mxu0 %v771_v49 }
 0x171   : > { %v324_v52 = vpop.f32.mrb[0].mxu0 }
 0x172   : > { %v325_v53 = vadd.f32 %v324_v52, %v256_v51  ;;  %v326_v54 = vpop.f32.mrb[1].mxu0 }
 0x173   : > { %v327_v57 = vadd.f32 %v326_v54, %v257_v56 }
 0x174   : > { %v720_v55 = vmul.f32 -1.442695, %v325_v53 }
 0x176   : > { %941 = vpow2.f32 %v720_v55 }
 0x177   : > { %943 = vtanh.f32 %v327_v57 }
 0x180   : > { %v942_v58 = vpop.eup %941 }
 0x181   : > { %v332_v59 = vadd.f32 1.0, %v942_v58  ;;  %v944_v60 = vpop.eup %943 }
 0x182   : > { %v336_v61 = vsub.f32 %v255_v50, %v944_v60 }
 0x183   : > { %945 = vrcp.f32 %v332_v59 }
 0x18d   : > { %v946_v62 = vpop.eup %945 }
 0x18e   : > { %v337_v63 = vmul.f32 %v946_v62, %v336_v61 }
 0x190   : > { %v338_v0 = vadd.f32 %v944_v60, %v337_v63 }
 0x192   : > { %339 = vst [vmem:[%s1346_s11] sm:$0xff] %v338_v0  ;;  %408 = vmatmul.mubr.f32.vlgmr.msra.gmra.mrb[0].mxu1 %v338_v0 }
 0x193   : > { %840 = vmatpush1.bf16.msra.mxu1 %v1354_v9  ;;  %579 = vmatprep.mubr.f32.mxu1 %v1132_v8 }
 0x194   : > { %842 = vmatprep.subr.bf16.mxu1 %v1356_v10 }
 0x197   : > { %844 = vmatpush1.bf16.msra.mxu1 %v1361_v15  ;;  %v725_v15 = vld [vmem:[%s1339_s28 + $0x20] sm:$0xff] }
 0x198   : > { %846 = vmatprep.subr.bf16.mxu1 %v1365_v16 }
 0x19b   : > { %848 = vmatpush1.bf16.msra.mxu1 %v1369_v21 }
 0x19c   : > { %850 = vmatprep.subr.bf16.mxu1 %v1373_v22 }
 0x19f   : > { %852 = vmatpush1.bf16.msra.mxu1 %v1377_v27 }
 0x1a0   : > { %854 = vmatprep.subr.bf16.mxu1 %v1381_v28 }
 0x1a3   : > { %856 = vmatpush1.bf16.msra.mxu1 %v1385_v33 }
 0x1a4   : > { %858 = vmatprep.subr.bf16.mxu1 %v1389_v34  ;;  %v730_v34 = vld [vmem:[%s1339_s28 + $0x38] sm:$0xff] }
 0x1a7   : > { %860 = vmatpush1.bf16.msra.mxu1 %v1393_v39 }
 0x1a8   : > { %862 = vmatprep.subr.bf16.mxu1 %v1397_v40 }
 0x1ab   : > { %864 = vmatpush1.bf16.msra.mxu1 %v1401_v45 }
 0x1ac   : > { %866 = vmatprep.subr.bf16.mxu1 %v1405_v46 }
 0x1af   : > { %868 = vmatpush1.bf16.msra.mxu1 %v771_v49 }
 0x265   : > { %v409_v2 = vpop.f32.mrb[0].mxu1 }
 0x266   : > { %v410_v3 = vadd.f32 %v721_v1, %v409_v2  ;;  %v411_v4 = vpop.f32.mrb[1].mxu1 }
 0x267   : > { %v412_v7 = vadd.f32 %v722_v6, %v411_v4 }
 0x268   : > { %v723_v5 = vmul.f32 -1.442695, %v410_v3 }
 0x26a   : > { %947 = vpow2.f32 %v723_v5 }
 0x26b   : > { %949 = vtanh.f32 %v412_v7 }
 0x274   : > { %v948_v8 = vpop.eup %947 }
 0x275   : > { %v417_v9 = vadd.f32 1.0, %v948_v8  ;;  %v950_v10 = vpop.eup %949 }
 0x276   : > { %v421_v11 = vsub.f32 %v338_v0, %v950_v10 }
 0x277   : > { %951 = vrcp.f32 %v417_v9 }
 0x281   : > { %v952_v12 = vpop.eup %951 }
 0x282   : > { %v422_v13 = vmul.f32 %v952_v12, %v421_v11 }
 0x284   : > { %v423_v14 = vadd.f32 %v950_v10, %v422_v13 }
 0x286   : > { %724 = vst [vmem:[%s1346_s11 + $0x8] sm:$0xff] %v423_v14  ;;  %494 = vmatmul.mubr.f32.vlgmr.msra.gmra.mrb[2].mxu0 %v423_v14 }
 0x359   : > { %v495_v16 = vpop.f32.mrb[2].mxu0 }
 0x35a   : > { %v496_v17 = vadd.f32 %v725_v15, %v495_v16  ;;  %v497_v18 = vpop.f32.mrb[3].mxu0 }
 0x35b   : > { %v498_v21 = vadd.f32 %v726_v20, %v497_v18 }
 0x35c   : > { %v727_v19 = vmul.f32 -1.442695, %v496_v17 }
 0x35e   : > { %953 = vpow2.f32 %v727_v19 }
 0x35f   : > { %955 = vtanh.f32 %v498_v21 }
 0x368   : > { %v954_v22 = vpop.eup %953 }
 0x369   : > { %v503_v23 = vadd.f32 1.0, %v954_v22  ;;  %v956_v24 = vpop.eup %955 }
 0x36a   : > { %v507_v25 = vsub.f32 %v423_v14, %v956_v24 }
 0x36b   : > { %957 = vrcp.f32 %v503_v23 }
 0x375   : > { %v958_v26 = vpop.eup %957 }
 0x376   : > { %v508_v27 = vmul.f32 %v958_v26, %v507_v25 }
 0x378   : > { %v509_v28 = vadd.f32 %v956_v24, %v508_v27 }
 0x37a   : > { %728 = vst [vmem:[%s1346_s11 + $0x10] sm:$0xff] %v509_v28  ;;  %580 = vmatmul.mubr.f32.vlgmr.msra.gmra.mrb[2].mxu1 %v509_v28 }
 0x44d   : > { %v581_v30 = vpop.f32.mrb[2].mxu1 }
 0x44e   : > { %v582_v31 = vadd.f32 %v729_v29, %v581_v30  ;;  %v583_v32 = vpop.f32.mrb[3].mxu1 }
 0x44f   : > { %v584_v35 = vadd.f32 %v730_v34, %v583_v32 }
 0x450   : > { %v731_v33 = vmul.f32 -1.442695, %v582_v31 }
 0x452   : > { %959 = vpow2.f32 %v731_v33 }
 0x453   : > { %961 = vtanh.f32 %v584_v35 }
 0x45c   : > { %v960_v36 = vpop.eup %959 }
 0x45d   : > { %v589_v37 = vadd.f32 1.0, %v960_v36  ;;  %v962_v38 = vpop.eup %961 }
 0x45e   : > { %v593_v39 = vsub.f32 %v509_v28, %v962_v38 }
 0x45f   : > { %963 = vrcp.f32 %v589_v37 }
 0x469   : > { %v964_v40 = vpop.eup %963 }
 0x46a   : > { %v594_v41 = vmul.f32 %v964_v40, %v593_v39 }
 0x46c   : > { %v595_v42 = vadd.f32 %v962_v38, %v594_v41 }
 0x46e   : > { %732 = vst [vmem:[%s1346_s11 + $0x18] sm:$0xff] %v595_v42  ;;  %598 = vst [vmem:[#allocation2] sm:$0xff] %v595_v42 }
 0x46f   : > { %1064 = shalt.err (!%p1061_p3)
}
 0x470   : > { %s1065_s10 = scalar_lea.hbm %s1460_s6, 512  ;;  %s1069_s26 = scalar_lea.hbm %s1509_s3, 1536 }
 0x471   : > { %p1066_p6 = scmp.ne.s32.totalorder %s1460_s6, %s1065_s10  ;;  %p1070_p9 = scmp.lt.u32.totalorder %s1460_s6, %s1509_s3 }
 0x472   : > { %p1071_p8 = scmp.lt.u32.totalorder %s1069_s26, %s1065_s10  ;;  %p1073_p2 = scmp.lt.u32.totalorder %s1065_s10, %s1460_s6 }
 0x473   : > { %p1067_p13 = pnand %p1066_p6, %p1532_p4 }
 0x474   : > { %p1072_p10 = por %p1071_p8, %p1070_p9 }
 0x475   : > { %p1068_p7 = pneg %p1067_p13 }
 0x476   : > { %p1074_p1 = por %p1073_p2, %p1072_p10 }
 0x478   : > { %p1075_p0 = pnand %p1074_p1, %p1068_p7 }
 0x47a   : > { %1078 = shalt.err (!%p1075_p0)
}
 0x47b   : > { %s1134_s22 = smov 128   ;;  %s1135_s11 = smov 8  }
 0x47c   : > { %879 = dma.vmem_to_hbm [thread:$0]  (%p1532_p4), %s1462_s4, 512, %s1460_s6, %s600_s8, %s1134_s22, %s1134_s22, %s1135_s11  }
 0x47d PF: > { %p901_p5 = scmp.ge.s32.totalorder %s1125_s15, 2  ;;  %s628_s23 = sand.u32 1, %s1113_s12  }
 0x47e   : > { %p1533_p11 = scmp.ne.s32.totalorder %s1518_s25, 0  ;;  %s629_s17 = scalar_lea.sflag [#allocation5], %s628_s23 }
 0x480   : > { %p893_p12 = pnand %p901_p5, %p1533_p11 }
 0x482   : > { %1108 = dma.done.wait (!%p893_p12), %s629_s17, 512  }
 0x483   : > { %1110 = vsyncadd (!%p893_p12), %s629_s17, 4294966784  ;;  %p15_p3 = scmp.ge.s32.totalorder %s1181_s18, 5   ;;  %s1534_s12 = smov %s1117_s13 }
 0x484   : > { %s1535_s13 = smov %s1121_s14  ;;  %s1536_s14 = smov %s1193_s21 }
 0x485   : > { %s1537_s15 = smov %s1181_s18  ;;  %17 = sbr.rel (!%p15_p3) target bundleno = 5 (0x5), region = 94 }
 0x48c   :  { %634 = vsyncpa [#allocation4], 1 }
 0x48d   :  { %636 = vsyncpa [#allocation4 + $0x1], 1 }
 0x48e   :  { %637 = vsyncpa [#allocation7], 1 }
 0x48f   :  { %638 = vsyncpa [#allocation5], 1 }
 0x490   :  { %640 = vsyncpa [#allocation5 + $0x1], 1 }

</bundles_post_ra>
